<compile_context>
chip_gen: v6e
topology: v6e:2x2x1
jax: 0.10.0
libtpu: 0.0.40
codegen_flags: <defaults>
</compile_context>

<pallas_src>
import jax
import jax.numpy as jnp
from jax.experimental import pallas as pl
from jax.experimental.pallas import tpu as pltpu


def _wsce_kernel(w_ref, x_ref, t_ref, o_ref):
    x = x_ref[...].astype(jnp.float32)       # (TN, Cp)
    t = t_ref[...].astype(jnp.float32)       # (TN, Cp)
    w = w_ref[...].astype(jnp.float32)       # (1, Cp) -> broadcasts over rows

    # Numerically-stable log-softmax pieces along the class (lane) axis.
    m = jnp.max(x, axis=-1, keepdims=True)                               # (TN, 1)
    shifted = x - m                                                      # (TN, Cp)
    lse = jnp.log(jnp.sum(jnp.exp(shifted), axis=-1, keepdims=True))     # (TN, 1)

    # Folded weighting: loss_row = sum(wt)*lse - sum(wt*shifted)
    wt = w * t                                                           # (TN, Cp)
    s1 = jnp.sum(wt, axis=-1, keepdims=True)                             # (TN, 1)
    s2 = jnp.sum(wt * shifted, axis=-1, keepdims=True)                   # (TN, 1)

    tile_loss = jnp.sum(s1 * lse - s2)                                   # scalar

    # Lane-dense partial-sum output block; distinct block per grid step -> parallel-safe.
    o_ref[...] = jnp.full(o_ref.shape, tile_loss, dtype=jnp.float32)


def _round_up(a, b):
    return ((a + b - 1) // b) * b


def weighted_soft_target_cross_entropy(
    x, target, weight, *, row_tile=None, vmem_stream_budget_bytes=8 * 1024 * 1024
):
    """x: (N, C), target: (N, C), weight: (C,). Returns scalar f32 loss."""
    n, c = x.shape
    assert target.shape == (n, c)
    assert weight.shape == (c,)

    # --- class-axis padding to a multiple of 128 (lane-dense blocks) ---
    c_pad = max(128, _round_up(c, 128))

    # --- row-tile selection from a double-buffered VMEM streaming budget ---
    itemsize = max(jnp.dtype(x.dtype).itemsize, jnp.dtype(target.dtype).itemsize)
    if row_tile is None:
        # 2 streamed inputs x 2 pipeline buffers x row_tile x c_pad x itemsize <= budget
        rt = vmem_stream_budget_bytes // (2 * 2 * c_pad * itemsize)
        rt = max(8, (rt // 8) * 8)
        rt = min(rt, 1024)                      # per-step overhead already amortized
        row_tile = min(rt, _round_up(n, 8))     # don't overshoot a small batch
    row_tile = max(8, _round_up(row_tile, 8))

    n_pad = _round_up(n, row_tile)
    num_tiles = n_pad // row_tile

    # --- padding of operands ---
    # Padded class lanes of x get a large-but-finite negative so max/LSE are
    # unaffected and wt*shifted stays finite (no 0 * inf). weight/target pad = 0.
    neg = float(jnp.finfo(x.dtype).min) / 2 if jnp.issubdtype(x.dtype, jnp.floating) else -1e9
    if c_pad != c:
        x = jnp.pad(x, ((0, 0), (0, c_pad - c)), constant_values=neg)
        target = jnp.pad(target, ((0, 0), (0, c_pad - c)))
        weight = jnp.pad(weight, (0, c_pad - c))
    if n_pad != n:
        # Padded rows: x = 0 (finite), target = 0  ->  zero contribution.
        x = jnp.pad(x, ((0, n_pad - n), (0, 0)))
        target = jnp.pad(target, ((0, n_pad - n), (0, 0)))

    w2d = weight.reshape(1, c_pad)

    partials = pl.pallas_call(
        _wsce_kernel,
        out_shape=jax.ShapeDtypeStruct((num_tiles, 128), jnp.float32),
        grid=(num_tiles,),
        in_specs=[
            pl.BlockSpec((1, c_pad), lambda i: (0, 0)),            # weight (constant block)
            pl.BlockSpec((row_tile, c_pad), lambda i: (i, 0)),     # x
            pl.BlockSpec((row_tile, c_pad), lambda i: (i, 0)),     # target
        ],
        out_specs=pl.BlockSpec((1, 128), lambda i: (i, 0)),        # per-tile partial sums
        compiler_params=pltpu.CompilerParams(
            dimension_semantics=("parallel",),
            vmem_limit_bytes=32 * 1024 * 1024,
        ),
    )(w2d, x, target)

    # Final reduction + mean over the ORIGINAL batch size in the wrapper.
    return jnp.sum(partials[:, 0]) * jnp.float32(1.0 / n)


def _reference(x, target, weight):
    log_sm = jax.nn.log_softmax(x.astype(jnp.float32), axis=-1)
    loss = jnp.sum(weight * (-target.astype(jnp.float32)) * log_sm, axis=-1)
    return jnp.mean(loss)


if __name__ == "__main__":
    key = jax.random.PRNGKey(0)

    # Case 1: small, already sublane-aligned batch; class axis needs lane padding.
    k1, k2, k3 = jax.random.split(key, 3)
    N, C = 8, 32
    x = jax.random.normal(k1, (N, C), dtype=jnp.float32)
    target = jax.nn.softmax(jax.random.normal(k2, (N, C), dtype=jnp.float32), axis=-1)
    weight = jax.random.uniform(k3, (C,), dtype=jnp.float32, minval=0.5, maxval=1.5)

    loss = jax.block_until_ready(weighted_soft_target_cross_entropy(x, target, weight))
    ref = _reference(x, target, weight)
    assert jnp.allclose(loss, ref, rtol=1e-5, atol=1e-5), (loss, ref)

    # Case 2: ragged batch and class counts -> exercises row + lane padding.
    k4, k5, k6 = jax.random.split(jax.random.PRNGKey(1), 3)
    N2, C2 = 12, 100
    x2 = jax.random.normal(k4, (N2, C2), dtype=jnp.float32)
    target2 = jax.nn.softmax(jax.random.normal(k5, (N2, C2), dtype=jnp.float32), axis=-1)
    weight2 = jax.random.uniform(k6, (C2,), dtype=jnp.float32, minval=0.5, maxval=1.5)

    loss2 = jax.block_until_ready(weighted_soft_target_cross_entropy(x2, target2, weight2))
    ref2 = _reference(x2, target2, weight2)
    assert jnp.allclose(loss2, ref2, rtol=1e-5, atol=1e-5), (loss2, ref2)

    print("KERNEL_OK")
</pallas_src>

<mosaic_0001>
module attributes {stable_mosaic.version = 11 : i64} {
  func.func @_wsce_kernel(%arg0: i32, %arg1: memref<1x128xf32, #tpu.memory_space<vmem>>, %arg2: memref<8x128xf32, #tpu.memory_space<vmem>>, %arg3: memref<8x128xf32, #tpu.memory_space<vmem>>, %arg4: memref<1x128xf32, #tpu.memory_space<vmem>>) attributes {dimension_semantics = [#tpu.dimension_semantics<parallel>], iteration_bounds = array<i64: 1>, scalar_prefetch = 0 : i64, scratch_operands = 0 : i64, tpu.core_type = #tpu.core_type<tc>, window_params = [{pipeline_mode = #tpu.pipeline_mode<synchronous>, transform_indices = @transform_0, window_bounds = array<i64: 1, 128>}, {transform_indices = @transform_1, window_bounds = array<i64: 8, 128>}, {transform_indices = @transform_2, window_bounds = array<i64: 8, 128>}, {transform_indices = @transform_3, window_bounds = array<i64: 1, 128>}]} {
    %c0 = arith.constant 0 : index
    %c0_0 = arith.constant 0 : index
    %0 = vector.load %arg2[%c0, %c0_0] : memref<8x128xf32, #tpu.memory_space<vmem>>, vector<8x128xf32>
    %c0_1 = arith.constant 0 : index
    %c0_2 = arith.constant 0 : index
    %1 = vector.load %arg3[%c0_1, %c0_2] : memref<8x128xf32, #tpu.memory_space<vmem>>, vector<8x128xf32>
    %c0_3 = arith.constant 0 : index
    %c0_4 = arith.constant 0 : index
    %2 = vector.load %arg1[%c0_3, %c0_4] : memref<1x128xf32, #tpu.memory_space<vmem>>, vector<1x128xf32>
    %cst = arith.constant dense<0xFF800000> : vector<8xf32>
    %3 = vector.multi_reduction <maximumf>, %0, %cst [1] : vector<8x128xf32> to vector<8xf32>
    %4 = vector.shape_cast %3 : vector<8xf32> to vector<8x1xf32>
    %5 = vector.broadcast %4 : vector<8x1xf32> to vector<8x128xf32>
    %6 = arith.subf %0, %5 : vector<8x128xf32>
    %7 = math.exp %6 : vector<8x128xf32>
    %cst_5 = arith.constant dense<0.000000e+00> : vector<8xf32>
    %8 = vector.multi_reduction <add>, %7, %cst_5 [1] : vector<8x128xf32> to vector<8xf32>
    %9 = vector.shape_cast %8 : vector<8xf32> to vector<8x1xf32>
    %10 = math.log %9 : vector<8x1xf32>
    %11 = vector.broadcast %2 : vector<1x128xf32> to vector<8x128xf32>
    %12 = arith.mulf %11, %1 : vector<8x128xf32>
    %cst_6 = arith.constant dense<0.000000e+00> : vector<8xf32>
    %13 = vector.multi_reduction <add>, %12, %cst_6 [1] : vector<8x128xf32> to vector<8xf32>
    %14 = vector.shape_cast %13 : vector<8xf32> to vector<8x1xf32>
    %15 = arith.mulf %12, %6 : vector<8x128xf32>
    %cst_7 = arith.constant dense<0.000000e+00> : vector<8xf32>
    %16 = vector.multi_reduction <add>, %15, %cst_7 [1] : vector<8x128xf32> to vector<8xf32>
    %17 = vector.shape_cast %16 : vector<8xf32> to vector<8x1xf32>
    %18 = arith.mulf %14, %10 : vector<8x1xf32>
    %19 = arith.subf %18, %17 : vector<8x1xf32>
    %20 = vector.shape_cast %19 : vector<8x1xf32> to vector<1x8x1xf32>
    %cst_8 = arith.constant dense<0.000000e+00> : vector<1xf32>
    %21 = vector.multi_reduction <add>, %20, %cst_8 [1, 2] : vector<1x8x1xf32> to vector<1xf32>
    %22 = vector.shape_cast %21 : vector<1xf32> to vector<1x1x1xf32>
    %23 = vector.extract %22[0, 0, 0] : f32 from vector<1x1x1xf32>
    %24 = vector.broadcast %23 : f32 to vector<1x128xf32>
    %c0_9 = arith.constant 0 : index
    %c0_10 = arith.constant 0 : index
    %25 = vector.load %arg4[%c0_9, %c0_10] : memref<1x128xf32, #tpu.memory_space<vmem>>, vector<1x128xf32>
    tpu.vector_store %arg4[%c0_9, %c0_10], %24 {strides = array<i32>} : memref<1x128xf32, #tpu.memory_space<vmem>>, vector<1x128xf32>,
    return
  }
  func.func @transform_0(%arg0: i32) -> (i32, i32) {
    %c0_i32 = arith.constant 0 : i32
    %c0_i32_0 = arith.constant 0 : i32
    %c0_i32_1 = arith.constant 0 : i32
    return %c0_i32, %c0_i32_0 : i32, i32
  }
  func.func @transform_1(%arg0: i32) -> (i32, i32) {
    %c0_i32 = arith.constant 0 : i32
    %c0_i32_0 = arith.constant 0 : i32
    return %arg0, %c0_i32 : i32, i32
  }
  func.func @transform_2(%arg0: i32) -> (i32, i32) {
    %c0_i32 = arith.constant 0 : i32
    %c0_i32_0 = arith.constant 0 : i32
    return %arg0, %c0_i32 : i32, i32
  }
  func.func @transform_3(%arg0: i32) -> (i32, i32) {
    %c0_i32 = arith.constant 0 : i32
    %c0_i32_0 = arith.constant 0 : i32
    return %arg0, %c0_i32 : i32, i32
  }
}

</mosaic_0001>

<bundles_post_ra>
// kernel: tpu_custom_call.1
= control target key start
LH: loop header
LB: loop body
LE: loop exit
PB: predicated region body
PF: predicated region fallthrough
CT: control target
= control target key end

     0   :  { %8 = vsyncpa [#allocation3], 0  ;;  %s238_s0 = inlined_call_operand.hbm [shape: f32[1,128], index: 0, kind: input, shape index: {}]   ;;  %s239_s1 = inlined_call_operand.hbm [shape: f32[8,128], index: 1, kind: input, shape index: {}]   ;;  %s240_s2 = inlined_call_operand.hbm [shape: f32[8,128], index: 2, kind: input, shape index: {}]   ;;  %s241_s3 = inlined_call_operand.hbm [shape: f32[1,128], index: 3, kind: output, shape index: {}]  }
   0x1   :  { %9 = vsyncpa [#allocation6], 0 }
   0x2   :  { %10 = vsyncpa [#allocation4], 0  ;;  %s202_s12 = smov [#allocation5]   ;;  %s203_s14 = smov [#allocation2]  }
   0x3   :  { %s27_s13 = sshll.u32 %s202_s12, 4  ;;  %s17_s15 = sshll.u32 %s203_s14, 4  ;;  %s28_s13 = int_to_ptr.vmem [resolvable:$true] %s27_s13  ;;  %s18_s15 = int_to_ptr.vmem [resolvable:$true] %s17_s15 }
   0x4   :  { %s124_s16 = scalar_lea.vmem %s28_s13, 128  ;;  %p129_p1 = scmp.lt.s32.totalorder %s28_s13, %s28_s13 }
   0x5   :  { %p125_p0 = scmp.ne.s32.totalorder %s28_s13, %s124_s16  ;;  %p130_p2 = scmp.lt.s32.totalorder %s124_s16, %s124_s16 }
   0x7   :  { %p131_p3 = por %p130_p2, %p129_p1 }
   0x9   :  { %p132_p4 = pnand %p131_p3, %p125_p0 }
   0xb   :  { %135 = shalt.err (!%p132_p4)
}
   0xc   :  { %30 = dma.hbm_to_vmem [thread:$0]  %s239_s1, 128, %s28_s13, [#allocation6]  }
   0xd   :  { %s144_s19 = scalar_lea.vmem %s18_s15, 16  ;;  %s148_s20 = scalar_lea.vmem %s18_s15, 32 }
   0xe   :  { %p145_p5 = scmp.ne.s32.totalorder %s18_s15, %s144_s19  ;;  %p149_p6 = scmp.lt.s32.totalorder %s18_s15, %s18_s15 }
   0xf   :  { %p150_p7 = scmp.lt.s32.totalorder %s148_s20, %s144_s19 }
  0x11   :  { %p151_p8 = por %p150_p7, %p149_p6 }
  0x13   :  { %p152_p9 = pnand %p151_p8, %p145_p5 }
  0x15   :  { %155 = shalt.err (!%p152_p9)
}
  0x16   :  { %20 = dma.hbm_to_vmem [thread:$0]  %s238_s0, 16, %s18_s15, [#allocation3]  }
  0x17   :  { %s204_s23 = smov [#allocation7]  }
  0x18   :  { %s37_s24 = sshll.u32 %s204_s23, 4  ;;  %s38_s24 = int_to_ptr.vmem [resolvable:$true] %s37_s24 }
  0x19   :  { %s164_s25 = scalar_lea.vmem %s38_s24, 128  ;;  %p169_p11 = scmp.lt.s32.totalorder %s38_s24, %s38_s24 }
  0x1a   :  { %p165_p10 = scmp.ne.s32.totalorder %s38_s24, %s164_s25  ;;  %p170_p12 = scmp.lt.s32.totalorder %s164_s25, %s164_s25 }
  0x1c   :  { %p171_p13 = por %p170_p12, %p169_p11 }
  0x1e   :  { %p172_p0 = pnand %p171_p13, %p165_p10 }
  0x20   :  { %175 = shalt.err (!%p172_p0)
}
  0x21   :  { %40 = dma.hbm_to_vmem [thread:$0]  %s240_s2, 128, %s38_s24, [#allocation6]  }
  0x22   :  { %196 = dma.done.wait [#allocation3], 16  }
  0x23   :  { %197 = vsyncadd [#allocation3], 4294967280 }
  0x24   :  { %198 = dma.done.wait [#allocation6], 256  }
  0x25   :  { %199 = vsyncadd [#allocation6], 4294967040  ;;  %v50_v0 = vld [vmem:[#allocation5] sm:$0xff]  ;;  %v51_v1 = vld [vmem:[#allocation7] sm:$0xff]  ;;  %vm76_vm0 = vcmask 7168   ;;  %s205_s0 = smov [#allocation8]  }
  0x26   :  { %53 = vmax.xlane.f32.xlu0 %v50_v0  ;;  %v105_v2 = vld [vmem:[#allocation2] ss:$0 sm:$0xff]  ;;  %s95_s2 = sshll.u32 %s205_s0, 4  ;;  %s96_s2 = int_to_ptr.vmem [resolvable:$true] %s95_s2 }
  0x27   :  { %v68_v3 = vmul.f32 %v105_v2, %v51_v1  ;;  %s176_s28 = scalar_lea.vmem %s96_s2, 16  ;;  %s180_s29 = scalar_lea.vmem %s96_s2, 32 }
  0x28   :  { %p177_p1 = scmp.ne.s32.totalorder %s96_s2, %s176_s28  ;;  %p181_p2 = scmp.lt.s32.totalorder %s96_s2, %s96_s2 }
  0x29   :  { %69 = vadd.xlane.f32.xlu1 %v68_v3  ;;  %p182_p3 = scmp.lt.s32.totalorder %s180_s29, %s176_s28 }
  0x2b   :  { %p183_p4 = por %p182_p3, %p181_p2 }
  0x2d   :  { %p184_p5 = pnand %p183_p4, %p177_p1 }
  0xaf   :  { %v54_v4 = vpop.xlane.xlu0 %53 }
  0xb0   :  { %v55_v5 = vsub.f32 %v50_v0, %v54_v4 }
  0xb2   :  { %v56_v6 = vmul.f32 1.442695, %v55_v5  ;;  %v71_v7 = vmul.f32 %v68_v3, %v55_v5  ;;  %v70_v10 = vpop.xlane.xlu1 %69 }
  0xb4   :  { %112 = vpow2.f32 %v56_v6  ;;  %72 = vadd.xlane.f32.xlu1 %v71_v7 }
  0xc1   :  { %v113_v8 = vpop.eup %112 }
  0xc2   :  { %58 = vadd.xlane.f32.xlu0 %v113_v8 }
 0x13d   :  { %v73_v14 = vpop.xlane.xlu1 %72 }
 0x14b   :  { %v59_v9 = vpop.xlane.xlu0 %58 }
 0x14c   :  { %114 = vlog2.f32 %v59_v9 }
 0x159   :  { %v115_v11 = vpop.eup %114 }
 0x15a   :  { %v61_v12 = vmul.f32 0.6931472, %v115_v11 }
 0x15c   :  { %v74_v13 = vmul.f32 %v70_v10, %v61_v12 }
 0x15e   :  { %v75_v15 = vsub.f32 %v74_v13, %v73_v14 }
 0x160   :  { %v77_v16 = vsel %vm76_vm0, %v75_v15, 0.0 }
 0x161   :  { %78 = vadd.xlane.f32.xlu0 %v77_v16 }
 0x1ea   :  { %v79_v17 = vpop.xlane.xlu0 %78 }
 0x1eb   :  { %v80_v18 = vrot.slane %v79_v17, 4 }
 0x1ed   :  { %v81_v19 = vadd.f32 %v80_v18, %v79_v17 }
 0x1ef   :  { %v82_v20 = vrot.slane %v81_v19, 2 }
 0x1f1   :  { %v83_v21 = vadd.f32 %v82_v20, %v81_v19 }
 0x1f3   :  { %v84_v22 = vrot.slane %v83_v21, 1 }
 0x1f5   :  { %v85_v23 = vadd.f32 %v84_v22, %v83_v21 }
 0x1f7   :  { %106 = vpush %v85_v23 }
 0x228   :  { %s107_s27 = spop %106 }
 0x229   :  { %v87_v24 = vstv %s107_s27 }
 0x22a   :  { %88 = vst [vmem:[#allocation8] sm:$0x1] %v87_v24 }
 0x22b   :  { %187 = shalt.err (!%p184_p5)
}
 0x22c   :  { %98 = dma.vmem_to_hbm [thread:$0]  %s96_s2, 16, %s241_s3, [#allocation4]  }
 0x22d   :  { %200 = dma.done.wait [#allocation4], 16  }
 0x22e   :  { %201 = vsyncadd [#allocation4], 4294967280 }
 0x22f   :  { %102 = vsyncpa [#allocation3], 1 }
 0x230   :  { %103 = vsyncpa [#allocation6], 1 }
 0x231   :  { %104 = vsyncpa [#allocation4], 1 }

</bundles_post_ra>
